<compile_context>
chip_gen: v5e
topology: v5e:2x2
jax: 0.10.0
libtpu: 0.0.40
codegen_flags: <defaults>
</compile_context>

<pallas_src>
import jax
import jax.numpy as jnp
from jax.experimental import pallas as pl
from jax.experimental.pallas import tpu as pltpu


def _conv1d_im2col_kernel(x_ref, w_ref, b_ref, o_ref):
    # x_ref: (C_in_p, bt*L)   w_ref: (C_out, K*C_in_p)
    # b_ref: (C_out, 1)       o_ref: (C_out, Wc)  with Wc = bt*L - K + 1
    c_in = x_ref.shape[0]
    k_size = w_ref.shape[1] // c_in
    wc = o_ref.shape[1]

    x = x_ref[...]
    # im2col: one (K*C_in, Wc) operand -> a single MXU matmul with a K-times
    # deeper contraction instead of K shallow per-tap dots.
    if k_size == 1:
        x_col = x[:, :wc]
    else:
        x_col = jnp.concatenate([x[:, k:k + wc] for k in range(k_size)], axis=0)

    acc = jnp.dot(w_ref[...], x_col, preferred_element_type=jnp.float32)
    o_ref[...] = (acc + b_ref[...]).astype(o_ref.dtype)


def norm_conv1d(x, weight, bias, *, stride=1, padding=0, batch_tile=None):
    """Conv1d forward (NormConv1d with norm='none'). Only stride=1 in-kernel."""
    assert stride == 1, "stride != 1 not needed for this module config"
    if padding > 0:
        # TODO(synk): fold zero-padding into the kernel (mask edge taps) to
        # avoid materializing an extra padded copy of x in HBM.
        x = jnp.pad(x, ((0, 0), (0, 0), (padding, padding)))

    B, C_in, L = x.shape
    C_out, C_in_w, K = weight.shape
    assert C_in == C_in_w
    L_out = L - K + 1
    assert L_out > 0

    bt = B if batch_tile is None else batch_tile
    assert B % bt == 0, "batch_tile must divide batch"
    nb = B // bt

    # ---- wrapper-side layout plumbing (no compute hoisting) ----
    # Pad channels to a multiple of 8 so the in-kernel sublane concat is aligned.
    c_pad = (-C_in) % 8
    if c_pad:
        x = jnp.pad(x, ((0, 0), (0, c_pad), (0, 0)))
        weight = jnp.pad(weight, ((0, 0), (0, c_pad), (0, 0)))
    C_in_p = C_in + c_pad

    # x: (B, C, L) -> (nb, C, bt*L): batch folded into the lane axis.
    x_lane = (x.reshape(nb, bt, C_in_p, L)
                .transpose(0, 2, 1, 3)
                .reshape(nb, C_in_p, bt * L))
    # weight: (C_out, C, K) -> (C_out, K*C): tap-major, matching the in-kernel
    # im2col row order (row index = k*C_in_p + c).
    w_flat = jnp.transpose(weight, (0, 2, 1)).reshape(C_out, K * C_in_p)
    bias2d = bias.reshape(C_out, 1)

    wc = bt * L - K + 1  # im2col columns per batch tile (lane-dense output slab)

    out3 = pl.pallas_call(
        _conv1d_im2col_kernel,
        out_shape=jax.ShapeDtypeStruct((nb, C_out, wc), x.dtype),
        grid_spec=pltpu.PrefetchScalarGridSpec(
            num_scalar_prefetch=0,
            grid=(nb,),
            in_specs=[
                pl.BlockSpec((None, C_in_p, bt * L), lambda i: (i, 0, 0)),
                pl.BlockSpec((C_out, K * C_in_p), lambda i: (0, 0)),
                pl.BlockSpec((C_out, 1), lambda i: (0, 0)),
            ],
            out_specs=pl.BlockSpec((None, C_out, wc), lambda i: (i, 0, 0)),
        ),
        compiler_params=pltpu.CompilerParams(
            dimension_semantics=("parallel",)),
    )(x_lane, w_flat, bias2d)

    # Drop the K-1 invalid tail columns of each in-tile batch element and
    # restore the (B, C_out, L_out) NCL layout.
    out3 = jnp.pad(out3, ((0, 0), (0, 0), (0, K - 1)))        # (nb, C_out, bt*L)
    out = (out3.reshape(nb, C_out, bt, L)[..., :L_out]         # (nb, C_out, bt, L_out)
               .transpose(0, 2, 1, 3)
               .reshape(B, C_out, L_out))
    return out


if __name__ == "__main__":
    # NormConv1d(in_channels=4, out_channels=8, kernel_size=3, norm='none')
    B, C_in, L = 2, 4, 16
    C_out, K = 8, 3

    key = jax.random.PRNGKey(0)
    kx, kw, kb = jax.random.split(key, 3)
    x = jax.random.normal(kx, (B, C_in, L), dtype=jnp.float32)
    # Deterministic init mimicking Conv1d's uniform(-1/sqrt(fan_in), +1/sqrt(fan_in))
    bound = 1.0 / (C_in * K) ** 0.5
    weight = jax.random.uniform(kw, (C_out, C_in, K), minval=-bound, maxval=bound,
                                dtype=jnp.float32)
    bias = jax.random.uniform(kb, (C_out,), minval=-bound, maxval=bound,
                              dtype=jnp.float32)

    out = norm_conv1d(x, weight, bias)
    out = jax.block_until_ready(out)

    # sanity check vs. lax reference (not part of the kernel hot path)
    ref = jax.lax.conv_general_dilated(
        x, weight, window_strides=(1,), padding="VALID",
        dimension_numbers=("NCH", "OIH", "NCH")) + bias[None, :, None]
    assert out.shape == (B, C_out, L - K + 1)
    assert jnp.allclose(out, ref, atol=1e-5, rtol=1e-5)

    print("KERNEL_OK")
</pallas_src>

<mosaic_0001>
module attributes {stable_mosaic.version = 11 : i64} {
  func.func @_conv1d_im2col_kernel(%arg0: i32, %arg1: memref<1x8x32xf32, #tpu.memory_space<vmem>>, %arg2: memref<8x24xf32, #tpu.memory_space<vmem>>, %arg3: memref<8x1xf32, #tpu.memory_space<vmem>>, %arg4: memref<1x8x30xf32, #tpu.memory_space<vmem>>) attributes {dimension_semantics = [#tpu.dimension_semantics<parallel>], iteration_bounds = array<i64: 1>, scalar_prefetch = 0 : i64, scratch_operands = 0 : i64, tpu.core_type = #tpu.core_type<tc>, window_params = [{transform_indices = @transform_0, window_bounds = array<i64: 1, 8, 32>}, {pipeline_mode = #tpu.pipeline_mode<synchronous>, transform_indices = @transform_1, window_bounds = array<i64: 8, 24>}, {pipeline_mode = #tpu.pipeline_mode<synchronous>, transform_indices = @transform_2, window_bounds = array<i64: 8, 1>}, {transform_indices = @transform_3, window_bounds = array<i64: 1, 8, 30>}]} {
    %c0 = arith.constant 0 : index
    %c0_0 = arith.constant 0 : index
    %c0_1 = arith.constant 0 : index
    %0 = vector.load %arg1[%c0, %c0_0, %c0_1] : memref<1x8x32xf32, #tpu.memory_space<vmem>>, vector<1x8x32xf32>
    %1 = vector.shape_cast %0 : vector<1x8x32xf32> to vector<8x32xf32>
    %2 = vector.extract_strided_slice %1 {offsets = [0, 0], sizes = [8, 30], strides = [1, 1]} : vector<8x32xf32> to vector<8x30xf32>
    %3 = vector.extract_strided_slice %1 {offsets = [0, 1], sizes = [8, 30], strides = [1, 1]} : vector<8x32xf32> to vector<8x30xf32>
    %4 = vector.extract_strided_slice %1 {offsets = [0, 2], sizes = [8, 30], strides = [1, 1]} : vector<8x32xf32> to vector<8x30xf32>
    %5 = tpu.concatenate %2, %3, %4 in 0 : vector<8x30xf32>, vector<8x30xf32>, vector<8x30xf32> -> vector<24x30xf32>
    %c0_2 = arith.constant 0 : index
    %c0_3 = arith.constant 0 : index
    %6 = vector.load %arg2[%c0_2, %c0_3] : memref<8x24xf32, #tpu.memory_space<vmem>>, vector<8x24xf32>
    %cst = arith.constant dense<0.000000e+00> : vector<8x30xf32>
    %7 = tpu.matmul %6, %5, %cst {dimension_numbers = #tpu.dot_dimension_numbers<[1], [0], [0], [1], [0, 0, 1, 1], [], []>} : vector<8x24xf32>, vector<24x30xf32>, vector<8x30xf32> -> vector<8x30xf32>
    %c0_4 = arith.constant 0 : index
    %c0_5 = arith.constant 0 : index
    %8 = vector.load %arg3[%c0_4, %c0_5] : memref<8x1xf32, #tpu.memory_space<vmem>>, vector<8x1xf32>
    %9 = vector.broadcast %8 : vector<8x1xf32> to vector<8x30xf32>
    %10 = arith.addf %7, %9 : vector<8x30xf32>
    %c0_6 = arith.constant 0 : index
    %c0_7 = arith.constant 0 : index
    %c0_8 = arith.constant 0 : index
    %11 = vector.load %arg4[%c0_6, %c0_7, %c0_8] : memref<1x8x30xf32, #tpu.memory_space<vmem>>, vector<1x8x30xf32>
    %12 = vector.shape_cast %11 : vector<1x8x30xf32> to vector<8x30xf32>
    %13 = vector.shape_cast %10 : vector<8x30xf32> to vector<1x8x30xf32>
    tpu.vector_store %arg4[%c0_6, %c0_7, %c0_8], %13 {strides = array<i32>} : memref<1x8x30xf32, #tpu.memory_space<vmem>>, vector<1x8x30xf32>,
    return
  }
  func.func @transform_0(%arg0: i32) -> (i32, i32, i32) {
    %c0_i32 = arith.constant 0 : i32
    %c0_i32_0 = arith.constant 0 : i32
    %c0_i32_1 = arith.constant 0 : i32
    return %arg0, %c0_i32, %c0_i32_0 : i32, i32, i32
  }
  func.func @transform_1(%arg0: i32) -> (i32, i32) {
    %c0_i32 = arith.constant 0 : i32
    %c0_i32_0 = arith.constant 0 : i32
    %c0_i32_1 = arith.constant 0 : i32
    return %c0_i32, %c0_i32_0 : i32, i32
  }
  func.func @transform_2(%arg0: i32) -> (i32, i32) {
    %c0_i32 = arith.constant 0 : i32
    %c0_i32_0 = arith.constant 0 : i32
    %c0_i32_1 = arith.constant 0 : i32
    return %c0_i32, %c0_i32_0 : i32, i32
  }
  func.func @transform_3(%arg0: i32) -> (i32, i32, i32) {
    %c0_i32 = arith.constant 0 : i32
    %c0_i32_0 = arith.constant 0 : i32
    %c0_i32_1 = arith.constant 0 : i32
    return %arg0, %c0_i32, %c0_i32_0 : i32, i32, i32
  }
}

</mosaic_0001>

<bundles_post_ra>
// kernel: tpu_custom_call.1
= control target key start
LH: loop header
LB: loop body
LE: loop exit
PB: predicated region body
PF: predicated region fallthrough
CT: control target
= control target key end

     0   :  { %8 = vsyncpa [#allocation3], 0  ;;  %s184_s0 = inlined_call_operand.vmem [shape: f32[1,8,32], index: 0, kind: input, shape index: {}]   ;;  %s185_s1 = inlined_call_operand.hbm [shape: f32[8,24], index: 1, kind: input, shape index: {}]   ;;  %s186_s2 = inlined_call_operand.vmem [shape: f32[8,1], index: 2, kind: input, shape index: {}]   ;;  %s187_s3 = inlined_call_operand.hbm [shape: f32[1,8,30], index: 3, kind: output, shape index: {}]  }
   0x1   :  { %9 = vsyncpa [#allocation4], 0  ;;  %s17_s14 = sshll.u32 %s185_s1, 4  ;;  %s147_s15 = smov [#allocation2]   ;;  %s18_s14 = int_to_ptr.hbm [resolvable:$true] %s17_s14 }
   0x2   :  { %s19_s16 = sshll.u32 %s147_s15, 4  ;;  %s20_s16 = int_to_ptr.vmem [resolvable:$true] %s19_s16 }
   0x3   :  { %22 = dma.hbm_to_vmem [thread:$0]  %s18_s14, 128, %s20_s16, [#allocation3]  }
   0x4   :  { %143 = dma.done.wait [#allocation3], 128  }
   0x5   :  { %144 = vsyncadd [#allocation3], 4294967168  ;;  %v29_v0 = vld [vmem:[%s184_s0] sm:$0xff]  ;;  %s148_s19 = smov 126   ;;  %s149_s20 = smov 127   ;;  %v150_v2 = vmov 0  }
   0x6   :  { %34 = vrot.lane.b32.xlu0 %v29_v0, %s148_s19  ;;  %v38_v1 = vld [vmem:[%s186_s2] sm:$0xff]  ;;  %93 = vset.pattern.permute.xlu1 %v150_v2  ;;  %vm44_vm0 = vcmask 195584   ;;  %s151_s0 = smov [#allocation5]   ;;  %s77_s25 = sshll.u32 %s187_s3, 4  ;;  %vm68_vm1 = vcmask 244736   ;;  %s78_s25 = int_to_ptr.hbm [resolvable:$true] %s77_s25 }
   0x7   :  { %94 = vset.pattern.permute.xlu0 %v150_v2  ;;  %41 = vperm.xlu1 %93, %v38_v1   ;;  %v37_v5 = vld [vmem:[#allocation2] sm:$0xff]  ;;  %s75_s1 = sshll.u32 %s151_s0, 4  ;;  %s76_s1 = int_to_ptr.vmem [resolvable:$true] %s75_s1 }
   0xe   :  { %31 = vrot.lane.b32.xlu0 %v29_v0, %s149_s20 }
  0x78   :  { %v35_v3 = vpop.permute.xlu0 %34 }
  0x79   :  { %61 = vmatpush.msra.mxu0 %v35_v3  ;;  %v42_v6 = vpop.permute.xlu1 %41 }
  0x80   :  { %v32_v4 = vpop.permute.xlu0 %31 }
  0x81   :  { %62 = vmatpush.msra.mxu0 %v32_v4 }
  0x83   :  { %63 = vmatpush.msra.mxu0 %v29_v0 }
  0x84   :  { %87 = vmatmul.msk.f32.vlgmr.msra.gmra.mxu0 %vm44_vm0, %v37_v5 }
 0x101   :  { %v65_v7 = vpop.f32.mrf.mxu0 }
 0x102   :  { %v66_v8 = vadd.f32 %v65_v7, %v42_v6 }
 0x104   :  { %69 = vst.msk [vmem:[#allocation5] sm:$0xff] %vm68_vm1, %v66_v8 }
 0x105   :  { %80 = dma.vmem_to_hbm [thread:$0]  %s76_s1, 128, %s78_s25, [#allocation4]  }
 0x106   :  { %145 = dma.done.wait [#allocation4], 128  }
 0x107   :  { %146 = vsyncadd [#allocation4], 4294967168 }
 0x108   :  { %85 = vsyncpa [#allocation3], 1 }
 0x109   :  { %86 = vsyncpa [#allocation4], 1 }

</bundles_post_ra>
